<compile_context>
chip_gen: v7x
topology: tpu7x:2x2x1
jax: 0.10.0
libtpu: 0.0.40
codegen_flags: <defaults>
</compile_context>

<pallas_src>
import jax
import jax.numpy as jnp
from jax.experimental import pallas as pl
from jax.experimental.pallas import tpu as pltpu

K_IN, H1, H2, N_OUT = 784, 256, 128, 10
N_PAD = 128  # lane-dense output width (10 -> 128); sliced back in the wrapper


def bpnet_kernel(x_ref, w1_ref, b1_ref, w2_ref, b2_ref, w3_ref, b3_ref, o_ref):
    # Three fused MXU matmuls with f32 accumulation; bias add + ReLU in f32,
    # activations cast to the compute dtype only right before the next dot.
    cdt = w1_ref.dtype
    x = x_ref[...].astype(cdt)  # in-kernel cast: no wrapper-side copy of x
    h = jnp.dot(x, w1_ref[...], preferred_element_type=jnp.float32) + b1_ref[...]
    h = jnp.maximum(h, 0.0).astype(cdt)
    h = jnp.dot(h, w2_ref[...], preferred_element_type=jnp.float32) + b2_ref[...]
    h = jnp.maximum(h, 0.0).astype(cdt)
    o_ref[...] = jnp.dot(h, w3_ref[...], preferred_element_type=jnp.float32) + b3_ref[...]


def _round_up(n, m):
    return ((n + m - 1) // m) * m


def prepare_params(params, compute_dtype=jnp.bfloat16):
    """One-time weight prep: cast to compute dtype, pad fc3 to the lane-dense
    output width. Do this once and reuse across forwards."""
    w1, b1, w2, b2, w3, b3 = params
    return (
        w1.astype(compute_dtype),                                         # (784, 256)
        b1.astype(jnp.float32),                                           # (1, 256)
        w2.astype(compute_dtype),                                         # (256, 128)
        b2.astype(jnp.float32),                                           # (1, 128)
        jnp.pad(w3, ((0, 0), (0, N_PAD - N_OUT))).astype(compute_dtype),  # (128, 128)
        jnp.pad(b3, ((0, 0), (0, N_PAD - N_OUT))).astype(jnp.float32),    # (1, 128)
    )


def _choose_tile(B, tb):
    """Batch tile: multiple of 8, no bigger than needed, and >= 2 grid steps
    whenever the batch allows (so v7x megacore keeps both TensorCores busy)."""
    tb_eff = min(_round_up(tb, 8), _round_up(B, 8))
    B_pad = _round_up(B, tb_eff)
    if B_pad // tb_eff < 2 and B_pad > 8:
        tb_eff = max(8, _round_up(B_pad // 2, 8))
        B_pad = _round_up(B, tb_eff)
    return tb_eff, B_pad


def bpnet_forward(x, prepared_params, *, tb=1024):
    """x: any shape whose trailing dims flatten to 784 (e.g. (B, 1, 28, 28)).

    prepared_params: output of prepare_params(); weights stored
    (in_features, out_features), biases (1, out_features) -- nn.Linear
    semantics with fc3 pre-padded to N_PAD columns.
    """
    w1p, b1p, w2p, b2p, w3p, b3p = prepared_params
    x2d = x.reshape(-1, K_IN)  # same semantics as torch x.view(-1, 784)
    B = x2d.shape[0]

    tb_eff, B_pad = _choose_tile(B, tb)
    grid = (B_pad // tb_eff,)

    # Only the batch rows are padded (zero rows are inert and sliced off);
    # the feature dim stays 784 -- Mosaic masks the K tail inside the fc1 dot.
    if B_pad != B:
        x2d = jnp.pad(x2d, ((0, B_pad - B), (0, 0)))

    full = lambda shape: pl.BlockSpec(shape, lambda i: (0,) * len(shape))

    wbytes = jnp.dtype(w1p.dtype).itemsize
    cost = pl.CostEstimate(
        flops=2 * B_pad * (K_IN * H1 + H1 * H2 + H2 * N_PAD),
        transcendentals=0,
        bytes_accessed=(B_pad * K_IN * jnp.dtype(x2d.dtype).itemsize      # x
                        + (K_IN * H1 + H1 * H2 + H2 * N_PAD) * wbytes     # weights
                        + (H1 + H2 + N_PAD) * 4                           # biases (f32)
                        + B_pad * N_PAD * 4),                             # output (f32)
    )

    out = pl.pallas_call(
        bpnet_kernel,
        out_shape=jax.ShapeDtypeStruct((B_pad, N_PAD), jnp.float32),
        grid_spec=pltpu.PrefetchScalarGridSpec(
            num_scalar_prefetch=0,
            grid=grid,
            in_specs=[
                pl.BlockSpec((tb_eff, K_IN), lambda i: (i, 0)),  # x tile, unpadded K
                full((K_IN, H1)), full((1, H1)),                 # fc1 (VMEM-resident)
                full((H1, H2)), full((1, H2)),                   # fc2
                full((H2, N_PAD)), full((1, N_PAD)),             # fc3 (padded N)
            ],
            out_specs=pl.BlockSpec((tb_eff, N_PAD), lambda i: (i, 0)),
        ),
        compiler_params=pltpu.CompilerParams(
            dimension_semantics=("parallel",),
            vmem_limit_bytes=32 * 1024 * 1024,
        ),
        cost_estimate=cost,
    )(x2d, w1p, b1p, w2p, b2p, w3p, b3p)

    return out[:B, :N_OUT]


def init_params(key):
    """Deterministic init mirroring nn.Linear shapes (stored as (in, out))."""
    ks = jax.random.split(key, 6)

    def linear(kw, kb, fan_in, fan_out):
        bound = 1.0 / jnp.sqrt(fan_in)
        w = jax.random.uniform(kw, (fan_in, fan_out), jnp.float32, -bound, bound)
        b = jax.random.uniform(kb, (1, fan_out), jnp.float32, -bound, bound)
        return w, b

    w1, b1 = linear(ks[0], ks[1], K_IN, H1)
    w2, b2 = linear(ks[2], ks[3], H1, H2)
    w3, b3 = linear(ks[4], ks[5], H2, N_OUT)
    return (w1, b1, w2, b2, w3, b3)


def bpnet_reference(x, params):
    w1, b1, w2, b2, w3, b3 = params
    h = x.reshape(-1, K_IN)
    h = jnp.maximum(h @ w1 + b1, 0.0)
    h = jnp.maximum(h @ w2 + b2, 0.0)
    return h @ w3 + b3


if __name__ == "__main__":
    key = jax.random.PRNGKey(0)
    kp, kx = jax.random.split(key)
    params = init_params(kp)

    # MNIST-like NCHW input; batch deliberately not a multiple of 8 to exercise
    # batch padding and the >=2-grid-step (megacore) tile split.
    x = jax.random.normal(kx, (12, 1, 28, 28), dtype=jnp.float32)
    ref = bpnet_reference(x, params)

    # Default bf16 compute path (full-rate MXU on v6e/v7x, halved weight DMA).
    params_bf16 = prepare_params(params)  # one-time prep, reused across calls
    out_bf16 = jax.block_until_ready(bpnet_forward(x, params_bf16))
    assert out_bf16.shape == (12, 10)
    assert jnp.allclose(out_bf16, ref, atol=5e-2, rtol=5e-2)

    # f32 compute path (tight match vs. on-device reference).
    params_f32 = prepare_params(params, compute_dtype=jnp.float32)
    out_f32 = jax.block_until_ready(bpnet_forward(x, params_f32))
    assert out_f32.shape == (12, 10)
    assert jnp.allclose(out_f32, ref, atol=1e-4, rtol=1e-4)

    print("KERNEL_OK")
</pallas_src>

<mosaic_0001>
module attributes {stable_mosaic.version = 11 : i64} {
  func.func @bpnet_kernel(%arg0: i32, %arg1: memref<8x784xf32, #tpu.memory_space<vmem>>, %arg2: memref<784x256xbf16, #tpu.memory_space<vmem>>, %arg3: memref<1x256xf32, #tpu.memory_space<vmem>>, %arg4: memref<256x128xbf16, #tpu.memory_space<vmem>>, %arg5: memref<1x128xf32, #tpu.memory_space<vmem>>, %arg6: memref<128x128xbf16, #tpu.memory_space<vmem>>, %arg7: memref<1x128xf32, #tpu.memory_space<vmem>>, %arg8: memref<8x128xf32, #tpu.memory_space<vmem>>) attributes {dimension_semantics = [#tpu.dimension_semantics<parallel>], iteration_bounds = array<i64: 2>, scalar_prefetch = 0 : i64, scratch_operands = 0 : i64, tpu.core_type = #tpu.core_type<tc>, window_params = [{transform_indices = @transform_0, window_bounds = array<i64: 8, 784>}, {pipeline_mode = #tpu.pipeline_mode<synchronous>, transform_indices = @transform_1, window_bounds = array<i64: 784, 256>}, {pipeline_mode = #tpu.pipeline_mode<synchronous>, transform_indices = @transform_2, window_bounds = array<i64: 1, 256>}, {pipeline_mode = #tpu.pipeline_mode<synchronous>, transform_indices = @transform_3, window_bounds = array<i64: 256, 128>}, {pipeline_mode = #tpu.pipeline_mode<synchronous>, transform_indices = @transform_4, window_bounds = array<i64: 1, 128>}, {pipeline_mode = #tpu.pipeline_mode<synchronous>, transform_indices = @transform_5, window_bounds = array<i64: 128, 128>}, {pipeline_mode = #tpu.pipeline_mode<synchronous>, transform_indices = @transform_6, window_bounds = array<i64: 1, 128>}, {transform_indices = @transform_7, window_bounds = array<i64: 8, 128>}]} {
    %c0 = arith.constant 0 : index
    %c0_0 = arith.constant 0 : index
    %0 = vector.load %arg1[%c0, %c0_0] : memref<8x784xf32, #tpu.memory_space<vmem>>, vector<8x784xf32>
    %1 = arith.truncf %0 : vector<8x784xf32> to vector<8x784xbf16>
    %c0_1 = arith.constant 0 : index
    %c0_2 = arith.constant 0 : index
    %2 = vector.load %arg2[%c0_1, %c0_2] : memref<784x256xbf16, #tpu.memory_space<vmem>>, vector<784x256xbf16>
    %cst = arith.constant dense<0.000000e+00> : vector<8x256xf32>
    %3 = tpu.matmul %1, %2, %cst {dimension_numbers = #tpu.dot_dimension_numbers<[1], [0], [0], [1], [0, 0, 1, 1], [], []>} : vector<8x784xbf16>, vector<784x256xbf16>, vector<8x256xf32> -> vector<8x256xf32>
    %c0_3 = arith.constant 0 : index
    %c0_4 = arith.constant 0 : index
    %4 = vector.load %arg3[%c0_3, %c0_4] : memref<1x256xf32, #tpu.memory_space<vmem>>, vector<1x256xf32>
    %5 = vector.broadcast %4 : vector<1x256xf32> to vector<8x256xf32>
    %6 = arith.addf %3, %5 : vector<8x256xf32>
    %cst_5 = arith.constant 0.000000e+00 : f32
    %7 = vector.broadcast %cst_5 : f32 to vector<8x256xf32>
    %8 = arith.maximumf %6, %7 : vector<8x256xf32>
    %9 = arith.truncf %8 : vector<8x256xf32> to vector<8x256xbf16>
    %c0_6 = arith.constant 0 : index
    %c0_7 = arith.constant 0 : index
    %10 = vector.load %arg4[%c0_6, %c0_7] : memref<256x128xbf16, #tpu.memory_space<vmem>>, vector<256x128xbf16>
    %cst_8 = arith.constant dense<0.000000e+00> : vector<8x128xf32>
    %11 = tpu.matmul %9, %10, %cst_8 {dimension_numbers = #tpu.dot_dimension_numbers<[1], [0], [0], [1], [0, 0, 1, 1], [], []>} : vector<8x256xbf16>, vector<256x128xbf16>, vector<8x128xf32> -> vector<8x128xf32>
    %c0_9 = arith.constant 0 : index
    %c0_10 = arith.constant 0 : index
    %12 = vector.load %arg5[%c0_9, %c0_10] : memref<1x128xf32, #tpu.memory_space<vmem>>, vector<1x128xf32>
    %13 = vector.broadcast %12 : vector<1x128xf32> to vector<8x128xf32>
    %14 = arith.addf %11, %13 : vector<8x128xf32>
    %cst_11 = arith.constant 0.000000e+00 : f32
    %15 = vector.broadcast %cst_11 : f32 to vector<8x128xf32>
    %16 = arith.maximumf %14, %15 : vector<8x128xf32>
    %17 = arith.truncf %16 : vector<8x128xf32> to vector<8x128xbf16>
    %c0_12 = arith.constant 0 : index
    %c0_13 = arith.constant 0 : index
    %18 = vector.load %arg6[%c0_12, %c0_13] : memref<128x128xbf16, #tpu.memory_space<vmem>>, vector<128x128xbf16>
    %cst_14 = arith.constant dense<0.000000e+00> : vector<8x128xf32>
    %19 = tpu.matmul %17, %18, %cst_14 {dimension_numbers = #tpu.dot_dimension_numbers<[1], [0], [0], [1], [0, 0, 1, 1], [], []>} : vector<8x128xbf16>, vector<128x128xbf16>, vector<8x128xf32> -> vector<8x128xf32>
    %c0_15 = arith.constant 0 : index
    %c0_16 = arith.constant 0 : index
    %20 = vector.load %arg7[%c0_15, %c0_16] : memref<1x128xf32, #tpu.memory_space<vmem>>, vector<1x128xf32>
    %21 = vector.broadcast %20 : vector<1x128xf32> to vector<8x128xf32>
    %22 = arith.addf %19, %21 : vector<8x128xf32>
    %c0_17 = arith.constant 0 : index
    %c0_18 = arith.constant 0 : index
    %23 = vector.load %arg8[%c0_17, %c0_18] : memref<8x128xf32, #tpu.memory_space<vmem>>, vector<8x128xf32>
    tpu.vector_store %arg8[%c0_17, %c0_18], %22 {strides = array<i32>} : memref<8x128xf32, #tpu.memory_space<vmem>>, vector<8x128xf32>,
    return
  }
  func.func @transform_0(%arg0: i32) -> (i32, i32) {
    %c0_i32 = arith.constant 0 : i32
    %c0_i32_0 = arith.constant 0 : i32
    return %arg0, %c0_i32 : i32, i32
  }
  func.func @transform_1(%arg0: i32) -> (i32, i32) {
    %c0_i32 = arith.constant 0 : i32
    %c0_i32_0 = arith.constant 0 : i32
    %c0_i32_1 = arith.constant 0 : i32
    return %c0_i32, %c0_i32_0 : i32, i32
  }
  func.func @transform_2(%arg0: i32) -> (i32, i32) {
    %c0_i32 = arith.constant 0 : i32
    %c0_i32_0 = arith.constant 0 : i32
    %c0_i32_1 = arith.constant 0 : i32
    return %c0_i32, %c0_i32_0 : i32, i32
  }
  func.func @transform_3(%arg0: i32) -> (i32, i32) {
    %c0_i32 = arith.constant 0 : i32
    %c0_i32_0 = arith.constant 0 : i32
    %c0_i32_1 = arith.constant 0 : i32
    return %c0_i32, %c0_i32_0 : i32, i32
  }
  func.func @transform_4(%arg0: i32) -> (i32, i32) {
    %c0_i32 = arith.constant 0 : i32
    %c0_i32_0 = arith.constant 0 : i32
    %c0_i32_1 = arith.constant 0 : i32
    return %c0_i32, %c0_i32_0 : i32, i32
  }
  func.func @transform_5(%arg0: i32) -> (i32, i32) {
    %c0_i32 = arith.constant 0 : i32
    %c0_i32_0 = arith.constant 0 : i32
    %c0_i32_1 = arith.constant 0 : i32
    return %c0_i32, %c0_i32_0 : i32, i32
  }
  func.func @transform_6(%arg0: i32) -> (i32, i32) {
    %c0_i32 = arith.constant 0 : i32
    %c0_i32_0 = arith.constant 0 : i32
    %c0_i32_1 = arith.constant 0 : i32
    return %c0_i32, %c0_i32_0 : i32, i32
  }
  func.func @transform_7(%arg0: i32) -> (i32, i32) {
    %c0_i32 = arith.constant 0 : i32
    %c0_i32_0 = arith.constant 0 : i32
    return %arg0, %c0_i32 : i32, i32
  }
}

</mosaic_0001>

<bundles_post_ra>
// kernel: tpu_custom_call.1
= control target key start
LH: loop header
LB: loop body
LE: loop exit
PB: predicated region body
PF: predicated region fallthrough
CT: control target
= control target key end

     0   :  { %s2502_s0 = inlined_call_operand.hbm [shape: f32[16,784], index: 0, kind: input, shape index: {}]   ;;  %s2503_s1 = inlined_call_operand.hbm [shape: bf16[784,256], index: 1, kind: input, shape index: {}]   ;;  %s2504_s2 = inlined_call_operand.vmem [shape: f32[1,256], index: 2, kind: input, shape index: {}]   ;;  %s2505_s3 = inlined_call_operand.hbm [shape: bf16[256,128], index: 3, kind: input, shape index: {}]   ;;  %s2506_s4 = inlined_call_operand.vmem [shape: f32[1,128], index: 4, kind: input, shape index: {}]   ;;  %s2507_s5 = inlined_call_operand.hbm [shape: bf16[128,128], index: 5, kind: input, shape index: {}]   ;;  %s2508_s6 = inlined_call_operand.vmem [shape: f32[1,128], index: 6, kind: input, shape index: {}]   ;;  %s2509_s7 = inlined_call_operand.hbm [shape: f32[16,128], index: 7, kind: output, shape index: {}]  }
   0x1   :  { %2514 = sst [smem:[#allocation16_spill]] %s2503_s1 }
   0x2   :  { %12 = vsyncpa [#allocation3], 0 }
   0x3   :  { %14 = vsyncpa [#allocation3 + $0x1], 0 }
   0x4   :  { %15 = vsyncpa [#allocation6], 0 }
   0x5   :  { %16 = vsyncpa [#allocation9], 0 }
   0x6   :  { %17 = vsyncpa [#allocation4], 0 }
   0x7   :  { %19 = vsyncpa [#allocation4 + $0x1], 0  ;;  %s2232_s24 = smov 0   ;;  %s2234_s25 = smov 0  }
   0x8   :  { %s2236_s26 = smov 0   ;;  %s2238_s27 = smov 0  }
   0x9 LB: > { %s2253_s28 = sadd.s32 4294967295, %s2178_s27   ;;  %s1528_s29 = sadd.s32 4294967294, %s2178_s27   ;;  %s2178_s27 = sphi %s2238_s27, %s2537_s27   ;;  %s2174_s26 = sphi %s2236_s26, %s2536_s26   ;;  %s2170_s25 = sphi %s2234_s25, %s2535_s25   ;;  %s2166_s24 = sphi %s2232_s24, %s2534_s24  }
   0xa   : > { %p45_p0 = scmp.ne.s32.totalorder %s2170_s25, %s2166_s24  ;;  %p2510_p1 = scmp.eq.s32.totalorder %s2253_s28, 0 }
   0xb   : > { %p201_p3 = scmp.eq.s32.totalorder %s1528_s29, 1  ;;  %p1529_p5 = scmp.ge.s32.totalorder %s2178_s27, 1 }
   0xc   : > { %p2262_p4 = por %p2510_p1, %p45_p0  ;;  %p208_p7 = scmp.lt.s32.totalorder %s2178_s27, 3 }
   0xd   : > { %p2267_p6 = por %p201_p3, %p45_p0  ;;  %s2180_s10 = smov [#allocation5]  }
   0xe   : > { %s2515_s30 = scalar_select %p2262_p4, 1, 0 }
   0xf   : > { %s2516_s8 = scalar_select %p2267_p6, 1, 0 }
  0x10   : > { %p2272_p8 = pnand %p1529_p5, %p208_p7  ;;  %s220_s11 = sshll.u32 %s2180_s10, 4  ;;  %s2276_s11 = int_to_ptr.vmem [resolvable:$true] %s220_s11 }
  0x11   : > { %2517 = sst [smem:[#allocation15_spill]] %s2516_s8  ;;  %s2181_s13 = smov [#allocation7]  }
  0x12   : > { %s2518_s9 = scalar_select %p2272_p8, 1, 0 }
  0x13   : > { %p1751_p9 = pneg %p2272_p8  ;;  %s236_s14 = sshll.u32 %s2181_s13, 4  ;;  %s2287_s14 = int_to_ptr.vmem [resolvable:$true] %s236_s14 }
  0x14   : > { %s2520_s1 = sld [smem:[#allocation16_spill]] }
  0x15   : > { %p2283_p11 = pnand %p1751_p9, %p2510_p1 }
  0x17   : > { %p2297_p13 = pneg %p2283_p11 }
  0x1a   : > { %s1990_s17 = scalar_lea.hbm %s2520_s1, 12544 }
  0x1b   : > { %p1991_p12 = scmp.ne.s32.totalorder %s2520_s1, %s1990_s17  ;;  %p1997_p5 = scmp.lt.u32.totalorder %s1990_s17, %s2520_s1 }
  0x1d   : > { %p1993_p0 = pnand %p2297_p13, %p1991_p12 }
  0x1f   : > { %p1994_p3 = pneg %p1993_p0 }
  0x21   : > { %p1999_p7 = pnand %p1997_p5, %p1994_p3 }
  0x23   : > { %2002 = shalt.err (!%p1999_p7)
}
  0x24   : > { %s2003_s23 = scalar_lea.vmem %s2276_s11, 12544  ;;  %p2011_p2 = scmp.lt.s32.totalorder %s2276_s11, %s2276_s11 }
  0x25   : > { %p2004_p9 = scmp.ne.s32.totalorder %s2276_s11, %s2003_s23  ;;  %p2012_p6 = scmp.lt.s32.totalorder %s2003_s23, %s2003_s23 }
  0x27   : > { %p2006_p10 = pnand %p2004_p9, %p2297_p13  ;;  %p2013_p12 = por %p2012_p6, %p2011_p2 }
  0x29   : > { %p2007_p1 = pneg %p2006_p10 }
  0x2b   : > { %p2014_p0 = pnand %p2013_p12, %p2007_p1 }
  0x2d   : > { %2017 = shalt.err (!%p2014_p0)
}
  0x2e   : > { %s2182_s29 = smov 128   ;;  %s2183_s10 = smov 8  }
  0x2f   : > { %1754 = dma.hbm_to_vmem [thread:$0]  (!%p2283_p11), %s2520_s1, 12544, %s2276_s11, [#allocation6], %s2182_s29, %s2182_s29, %s2183_s10  }
  0x30   : > { %s2018_s18 = scalar_lea.hbm %s2505_s3, 2048 }
  0x31   : > { %p2019_p2 = scmp.ne.s32.totalorder %s2505_s3, %s2018_s18  ;;  %p2025_p10 = scmp.lt.u32.totalorder %s2018_s18, %s2505_s3 }
  0x33   : > { %p2021_p1 = pnand %p2019_p2, %p2297_p13 }
  0x35   : > { %p2022_p6 = pneg %p2021_p1 }
  0x37   : > { %p2027_p3 = pnand %p2025_p10, %p2022_p6 }
  0x39   : > { %2030 = shalt.err (!%p2027_p3)
}
  0x3a   : > { %s2031_s11 = scalar_lea.vmem %s2287_s14, 2048  ;;  %p2039_p12 = scmp.lt.s32.totalorder %s2287_s14, %s2287_s14 }
  0x3b   : > { %p2032_p5 = scmp.ne.s32.totalorder %s2287_s14, %s2031_s11  ;;  %p2040_p0 = scmp.lt.s32.totalorder %s2031_s11, %s2031_s11 }
  0x3d   : > { %p2034_p7 = pnand %p2032_p5, %p2297_p13  ;;  %p2041_p2 = por %p2040_p0, %p2039_p12 }
  0x3f   : > { %p2035_p9 = pneg %p2034_p7 }
  0x41   : > { %p2042_p1 = pnand %p2041_p2, %p2035_p9 }
  0x43   : > { %2045 = shalt.err (!%p2042_p1)
}
  0x44   : > { %s2184_s29 = smov 64   ;;  %s2185_s10 = smov 4  }
  0x45   : > { %1757 = dma.hbm_to_vmem [thread:$0]  (!%p2283_p11), %s2505_s3, 2048, %s2287_s14, [#allocation6], %s2184_s29, %s2184_s29, %s2185_s10  }
  0x46   : > { %s2186_s16 = smov [#allocation8]   ;;  %s2342_s18 = sadd.s32 1, %s2178_s27  }
  0x47   : > { %s252_s17 = sshll.u32 %s2186_s16, 4  ;;  %s2046_s22 = scalar_lea.hbm %s2507_s5, 1024  ;;  %s253_s17 = int_to_ptr.vmem [resolvable:$true] %s252_s17 }
  0x48   : > { %p2047_p6 = scmp.ne.s32.totalorder %s2507_s5, %s2046_s22  ;;  %p2053_p5 = scmp.lt.u32.totalorder %s2046_s22, %s2507_s5 }
  0x4a   : > { %p2049_p10 = pnand %p2047_p6, %p2297_p13 }
  0x4c   : > { %p2050_p3 = pneg %p2049_p10 }
  0x4e   : > { %p2055_p7 = pnand %p2053_p5, %p2050_p3 }
  0x50   : > { %2058 = shalt.err (!%p2055_p7)
}
  0x51   : > { %s2059_s14 = scalar_lea.vmem %s253_s17, 1024  ;;  %p2067_p2 = scmp.lt.s32.totalorder %s253_s17, %s253_s17 }
  0x52   : > { %p2060_p9 = scmp.ne.s32.totalorder %s253_s17, %s2059_s14  ;;  %p2068_p1 = scmp.lt.s32.totalorder %s2059_s14, %s2059_s14 }
  0x54   : > { %p2062_p12 = pnand %p2060_p9, %p2297_p13  ;;  %p2069_p4 = por %p2068_p1, %p2067_p2 }
  0x56   : > { %p2063_p0 = pneg %p2062_p12 }
  0x58   : > { %p2070_p8 = pnand %p2069_p4, %p2063_p0 }
  0x5a   : > { %2073 = shalt.err (!%p2070_p8)
}
  0x5b   : > { %1760 = dma.hbm_to_vmem [thread:$0]  (!%p2283_p11), %s2507_s5, 1024, %s253_s17, [#allocation9], %s2184_s29, %s2184_s29, %s2185_s10  }
  0x5c   : > { %s29_s1 = ssub.s32 %s2178_s27, %s2342_s18  ;;  %s32_s8 = sadd.s32 1, %s2174_s26 }
  0x5d   : > { %p30_p4 = scmp.eq.s32.totalorder %s29_s1, 0  ;;  %p39_p8 = scmp.ne.s32.totalorder %s2174_s26, %s2170_s25 }
  0x5e   : > { %p40_p13 = scmp.eq.s32.totalorder %s2178_s27, 0  ;;  %p1772_p6 = scmp.lt.s32.totalorder %s2178_s27, 2 }
  0x5f   : > { %s2370_s12 = scalar_select %p30_p4, %s2174_s26, %s32_s8  }
  0x60   : > { %p41_p10 = por %p40_p13, %p39_p8  ;;  %p2522_p3 = scmp.eq.s32.totalorder %s2253_s28, 1 }
  0x61   : > { %s269_s16 = sand.u32 1, %s2174_s26   ;;  %s1733_s19 = smul.u32 896, %s2178_s27 }
  0x62   : > { %p2374_p5 = por %p2522_p3, %p39_p8  ;;  %s1732_s21 = smul.u32 56, %s269_s16 }
  0x63   : > { %p2380_p7 = pnand %p1772_p6, %p41_p10  ;;  %s2387_s17 = scalar_lea.hbm %s2502_s0, %s1733_s19 }
  0x64   : > { %s273_s23 = scalar_lea.vmem [#allocation2], %s1732_s21  ;;  %s270_s14 = scalar_lea.sflag [#allocation3], %s269_s16 }
  0x65   : > { %s281_s11 = sshll.u32 %s273_s23, 4  ;;  %s2074_s13 = scalar_lea.hbm %s2387_s17, 896  ;;  %s2389_s11 = int_to_ptr.vmem [resolvable:$true] %s281_s11 }
  0x66   : > { %p2075_p11 = scmp.ne.s32.totalorder %s2387_s17, %s2074_s13  ;;  %p2076_p9 = pneg %p2380_p7 }
  0x67   : > { %s2079_s8 = scalar_lea.hbm %s2502_s0, 1792  ;;  %p2080_p2 = scmp.lt.u32.totalorder %s2387_s17, %s2502_s0 }
  0x68   : > { %p2077_p12 = pnand %p2076_p9, %p2075_p11  ;;  %p2081_p1 = scmp.lt.u32.totalorder %s2079_s8, %s2074_s13 }
  0x69   : > { %p2083_p8 = scmp.lt.u32.totalorder %s2074_s13, %s2387_s17 }
  0x6a   : > { %p2078_p0 = pneg %p2077_p12  ;;  %p2082_p4 = por %p2081_p1, %p2080_p2 }
  0x6c   : > { %p2084_p13 = por %p2083_p8, %p2082_p4 }
  0x6e   : > { %p2085_p6 = pnand %p2084_p13, %p2078_p0 }
  0x70   : > { %2088 = shalt.err (!%p2085_p6)
}
  0x71   : > { %s2089_s16 = scalar_lea.vmem %s2389_s11, 896  ;;  %s2187_s21 = smov [#allocation2]  }
  0x72   : > { %p2090_p10 = scmp.ne.s32.totalorder %s2389_s11, %s2089_s16  ;;  %s2094_s10 = sshll.u32 %s2187_s21, 4  ;;  %s2095_s10 = int_to_ptr.vmem [resolvable:$false] %s2094_s10 }
  0x73   : > { %s2096_s23 = scalar_lea.vmem %s2095_s10, 1792  ;;  %p2097_p12 = scmp.lt.s32.totalorder %s2389_s11, %s2095_s10 }
  0x74   : > { %p2092_p3 = pnand %p2090_p10, %p2076_p9  ;;  %p2098_p2 = scmp.lt.s32.totalorder %s2096_s23, %s2089_s16 }
  0x76   : > { %p2093_p11 = pneg %p2092_p3  ;;  %p2099_p1 = por %p2098_p2, %p2097_p12 }
  0x78   : > { %p2100_p4 = pnand %p2099_p1, %p2093_p11 }
  0x7a   : > { %2103 = shalt.err (!%p2100_p4)
}
  0x7b   : > { %1764 = dma.hbm_to_vmem [thread:$0]  (!%p2380_p7), %s2387_s17, 896, %s2389_s11, %s270_s14  }
  0x7c   : > { %p2525_p0 = scmp.ne.s32.totalorder %s2518_s9, 0 }
  0x7d   : > { %s2419_s13 = sand.u32 (!%p2525_p0), 1, %s2170_s25   ;;  %p2526_p9 = scmp.ne.s32.totalorder (!%p2525_p0), %s2515_s30, 0 }
  0x7e   : > { %290 = sbr.rel (%p2525_p0) target bundleno = 950 (0x3b6), region = 48  ;;  %s293_s1 = scalar_lea.sflag (!%p2525_p0), [#allocation3], %s2419_s13 }
  0x7f   : > { %s1734_s15 = smul.u32 (!%p2525_p0), 56, %s2419_s13 }
  0x81   : > { %s2423_s8 = scalar_lea.vmem (!%p2525_p0), [#allocation2], %s1734_s15 }
  0x85   : > { %2149 = dma.done.wait (%p2526_p9), %s293_s1, 896  }
  0x86   : > { %2151 = vsyncadd (%p2526_p9), %s293_s1, 4294966400  ;;  %p2527_p7 = scmp.eq.s32.totalorder %s2253_s28, 0 }
  0x88   : > { %2153 = dma.done.wait (%p2527_p7), [#allocation6], 14592   ;;  %p2528_p8 = pmov %p2527_p7 }
  0x89   : > { %p2529_p13 = pmov %p2527_p7 }
  0x8a   : > { %2155 = vsyncadd (%p2528_p8), [#allocation6], 4294952704 }
  0x8b   : > { %2157 = dma.done.wait (%p2529_p13), [#allocation9], 1024   ;;  %p2530_p6 = pmov %p2527_p7 }
  0x8c   : > { %v1819_v0 = vld [vmem:[#allocation5 + $0x104] ss:$8 sps:$4 sm:$0xff]   ;;  %v1821_v1 = vld [vmem:[#allocation5 + $0x100] ss:$8 sps:$4 sm:$0xff]   ;;  %v1822_v2 = vld [vmem:[#allocation5 + $0x114] ss:$8 sps:$4 sm:$0xff]  }
  0x8d   : > { %2159 = vsyncadd (%p2530_p6), [#allocation9], 4294966272  ;;  %999 = vmatprep.subr.bf16.mxu0 %v1819_v0  ;;  %v1824_v3 = vld [vmem:[#allocation5 + $0x110] ss:$8 sps:$4 sm:$0xff]   ;;  %v1825_v4 = vld [vmem:[#allocation5 + $0x124] ss:$8 sps:$4 sm:$0xff]  }
  0x8e   : > { %1000 = vmatpush1.bf16.msra.mxu0 %v1821_v1  ;;  %v1827_v5 = vld [vmem:[#allocation5 + $0x120] ss:$8 sps:$4 sm:$0xff]   ;;  %v1828_v6 = vld [vmem:[#allocation5 + $0x134] ss:$8 sps:$4 sm:$0xff]   ;;  %v1830_v7 = vld [vmem:[#allocation5 + $0x130] ss:$8 sps:$4 sm:$0xff]  }
  0x8f   : > { %1001 = vmatprep.subr.bf16.mxu0 %v1822_v2  ;;  %v1831_v8 = vld [vmem:[#allocation5 + $0x144] ss:$8 sps:$4 sm:$0xff]   ;;  %v1833_v9 = vld [vmem:[#allocation5 + $0x140] ss:$8 sps:$4 sm:$0xff]   ;;  %v1834_v10 = vld [vmem:[#allocation5 + $0x154] ss:$8 sps:$4 sm:$0xff]  }
  0x90   : > { %v1836_v11 = vld [vmem:[#allocation5 + $0x150] ss:$8 sps:$4 sm:$0xff]   ;;  %v1837_v12 = vld [vmem:[#allocation5 + $0x164] ss:$8 sps:$4 sm:$0xff]   ;;  %v1839_v15 = vld [vmem:[#allocation5 + $0x160] ss:$8 sps:$4 sm:$0xff]  }
  0x91   : > { %v343_v13 = vld [vmem:[%s2423_s8 + $0x18] sm:$0xff]  ;;  %v1840_v16 = vld [vmem:[#allocation5 + $0x174] ss:$8 sps:$4 sm:$0xff]   ;;  %v1842_v18 = vld [vmem:[#allocation5 + $0x170] ss:$8 sps:$4 sm:$0xff]   ;;  %vm954_vm0 = vcmask 130048  }
  0x92   : > { %1002 = vmatpush1.bf16.msra.mxu0 %v1824_v3  ;;  %v350_v14 = vpack.c.bf16 %v343_v13, %v343_v13  ;;  %v1873_v17 = vld [vmem:[#allocation5 + $0x4] ss:$8 sps:$4 sm:$0xff]   ;;  %v1878_v20 = vld [vmem:[#allocation5] ss:$8 sps:$4 sm:$0xff]   ;;  %v1879_v21 = vld [vmem:[#allocation5 + $0x14] ss:$8 sps:$4 sm:$0xff]  }
  0x93   : > { %1003 = vmatprep.subr.bf16.mxu0 %v1825_v4  ;;  %v1843_v19 = vld [vmem:[#allocation5 + $0x184] ss:$8 sps:$4 sm:$0xff]   ;;  %958 = vmatprep.subr.bf16.mxu1 %v1873_v17  ;;  %v1884_v22 = vld [vmem:[#allocation5 + $0x10] ss:$8 sps:$4 sm:$0xff]   ;;  %v1845_v24 = vld [vmem:[#allocation5 + $0x180] ss:$8 sps:$4 sm:$0xff]  }
  0x94   : > { %1031 = vmatprep.mubr.bf16.mxu0 %v350_v14  ;;  %959 = vmatpush1.bf16.msra.mxu1 %v1878_v20  ;;  %v1885_v23 = vld [vmem:[#allocation5 + $0x24] ss:$8 sps:$4 sm:$0xff]   ;;  %v1846_v25 = vld [vmem:[#allocation5 + $0x194] ss:$8 sps:$4 sm:$0xff]   ;;  %v1890_v26 = vld [vmem:[#allocation5 + $0x20] ss:$8 sps:$4 sm:$0xff]  }
  0x95   : > { %960 = vmatprep.subr.bf16.mxu1 %v1879_v21  ;;  %v1891_v27 = vld [vmem:[#allocation5 + $0x34] ss:$8 sps:$4 sm:$0xff]   ;;  %v1848_v28 = vld [vmem:[#allocation5 + $0x190] ss:$8 sps:$4 sm:$0xff]   ;;  %v1849_v29 = vld [vmem:[#allocation5 + $0x1a4] ss:$8 sps:$4 sm:$0xff]  }
  0x96   : > { %1004 = vmatpush1.bf16.msra.mxu0 %v1827_v5  ;;  %v1896_v30 = vld [vmem:[#allocation5 + $0x30] ss:$8 sps:$4 sm:$0xff]   ;;  %v1897_v31 = vld [vmem:[#allocation5 + $0x44] ss:$8 sps:$4 sm:$0xff]   ;;  %v1851_v32 = vld [vmem:[#allocation5 + $0x1a0] ss:$8 sps:$4 sm:$0xff]  }
  0x97   : > { %1005 = vmatprep.subr.bf16.mxu0 %v1828_v6  ;;  %v1852_v33 = vld [vmem:[#allocation5 + $0x1b4] ss:$8 sps:$4 sm:$0xff]   ;;  %v1902_v34 = vld [vmem:[#allocation5 + $0x40] ss:$8 sps:$4 sm:$0xff]   ;;  %v1854_v36 = vld [vmem:[#allocation5 + $0x1b0] ss:$8 sps:$4 sm:$0xff]  }
  0x98   : > { %961 = vmatpush1.bf16.msra.mxu1 %v1884_v22  ;;  %v1903_v35 = vld [vmem:[#allocation5 + $0x54] ss:$8 sps:$4 sm:$0xff]   ;;  %v1855_v37 = vld [vmem:[#allocation5 + $0x1c4] ss:$8 sps:$4 sm:$0xff]   ;;  %v1908_v38 = vld [vmem:[#allocation5 + $0x50] ss:$8 sps:$4 sm:$0xff]  }
  0x99   : > { %962 = vmatprep.subr.bf16.mxu1 %v1885_v23  ;;  %v1909_v39 = vld [vmem:[#allocation5 + $0x64] ss:$8 sps:$4 sm:$0xff]   ;;  %v1857_v40 = vld [vmem:[#allocation5 + $0x1c0] ss:$8 sps:$4 sm:$0xff]   ;;  %v1858_v41 = vld [vmem:[#allocation5 + $0x1d4] ss:$8 sps:$4 sm:$0xff]  }
  0x9a   : > { %1006 = vmatpush1.bf16.msra.mxu0 %v1830_v7  ;;  %v1914_v42 = vld [vmem:[#allocation5 + $0x60] ss:$8 sps:$4 sm:$0xff]   ;;  %v1915_v43 = vld [vmem:[#allocation5 + $0x74] ss:$8 sps:$4 sm:$0xff]   ;;  %v1860_v44 = vld [vmem:[#allocation5 + $0x1d0] ss:$8 sps:$4 sm:$0xff]  }
  0x9b   : > { %1007 = vmatprep.subr.bf16.mxu0 %v1831_v8  ;;  %v1861_v45 = vld [vmem:[#allocation5 + $0x1e4] ss:$8 sps:$4 sm:$0xff]   ;;  %v1920_v46 = vld [vmem:[#allocation5 + $0x70] ss:$8 sps:$4 sm:$0xff]   ;;  %v1863_v48 = vld [vmem:[#allocation5 + $0x1e0] ss:$8 sps:$4 sm:$0xff]  }
  0x9c   : > { %963 = vmatpush1.bf16.msra.mxu1 %v1890_v26  ;;  %v1921_v47 = vld [vmem:[#allocation5 + $0x84] ss:$8 sps:$4 sm:$0xff]   ;;  %v1864_v49 = vld [vmem:[#allocation5 + $0x1f4] ss:$8 sps:$4 sm:$0xff]   ;;  %v1926_v50 = vld [vmem:[#allocation5 + $0x80] ss:$8 sps:$4 sm:$0xff]  }
  0x9d   : > { %964 = vmatprep.subr.bf16.mxu1 %v1891_v27  ;;  %v1866_v51 = vld [vmem:[#allocation5 + $0x1f0] ss:$8 sps:$4 sm:$0xff]   ;;  %v1927_v52 = vld [vmem:[#allocation5 + $0x94] ss:$8 sps:$4 sm:$0xff]   ;;  %v1869_v54 = vld [vmem:[#allocation5 + $0x204] ss:$8 sps:$4 sm:$0xff]  }
  0x9e   : > { %1008 = vmatpush1.bf16.msra.mxu0 %v1833_v9  ;;  %v342_v53 = vld [vmem:[%s2423_s8 + $0x10] sm:$0xff]  ;;  %v345_v58 = vld [vmem:[%s2423_s8 + $0x28] sm:$0xff]  ;;  %v340_v21 = vld [vmem:[%s2423_s8] sm:$0xff]  ;;  %vm2190_vm1 = vmmov 0   ;;  %s1539_s11 = sshll.u32 %s2419_s13, 3  ;;  %s1666_s29 = sshll.u32 %s2253_s28, 7 }
  0x9f   : > { %1009 = vmatprep.subr.bf16.mxu0 %v1834_v10  ;;  %v1932_v55 = vld [vmem:[#allocation5 + $0x90] ss:$8 sps:$4 sm:$0xff]   ;;  %v1933_v56 = vld [vmem:[#allocation5 + $0xa4] ss:$8 sps:$4 sm:$0xff]   ;;  %v349_v57 = vpack.c.bf16 %v342_v53, %v342_v53  ;;  %v1867_v59 = vld [vmem:[#allocation5 + $0x200] ss:$8 sps:$4 sm:$0xff]   ;;  %v352_v60 = vpack.c.bf16 %v345_v58, %v345_v58  ;;  %s2458_s15 = scalar_lea.hbm %s2509_s7, %s1666_s29 }
  0xa0   : > { %965 = vmatpush1.bf16.msra.mxu1 %v1896_v30  ;;  %v1872_v61 = vld [vmem:[#allocation5 + $0x214] ss:$8 sps:$4 sm:$0xff]   ;;  %v1938_v62 = vld [vmem:[#allocation5 + $0xa0] ss:$8 sps:$4 sm:$0xff]   ;;  %v1870_v1 = vld [vmem:[#allocation5 + $0x210] ss:$8 sps:$4 sm:$0xff]  }
  0xa1   : > { %966 = vmatprep.subr.bf16.mxu1 %v1897_v31  ;;  %v1939_v63 = vld [vmem:[#allocation5 + $0xb4] ss:$8 sps:$4 sm:$0xff]   ;;  %v1877_v3 = vld [vmem:[#allocation5 + $0x224] ss:$8 sps:$4 sm:$0xff]   ;;  %v1944_v4 = vld [vmem:[#allocation5 + $0xb0] ss:$8 sps:$4 sm:$0xff]  }
  0xa2   : > { %1010 = vmatpush1.bf16.msra.mxu0 %v1836_v11  ;;  %v341_v0 = vld [vmem:[%s2423_s8 + $0x8] sm:$0xff]  ;;  %v1945_v5 = vld [vmem:[#allocation5 + $0xc4] ss:$8 sps:$4 sm:$0xff]   ;;  %v1875_v6 = vld [vmem:[#allocation5 + $0x220] ss:$8 sps:$4 sm:$0xff]   ;;  %s338_s16 = scalar_lea.vmem [#allocation10], %s1539_s11 }
  0xa3   : > { %1011 = vmatprep.subr.bf16.mxu0 %v1837_v12  ;;  %v348_v2 = vpack.c.bf16 %v341_v0, %v341_v0  ;;  %v1883_v7 = vld [vmem:[#allocation5 + $0x234] ss:$8 sps:$4 sm:$0xff]   ;;  %v1950_v8 = vld [vmem:[#allocation5 + $0xc0] ss:$8 sps:$4 sm:$0xff]   ;;  %v1881_v10 = vld [vmem:[#allocation5 + $0x230] ss:$8 sps:$4 sm:$0xff]  }
  0xa4   : > { %967 = vmatpush1.bf16.msra.mxu1 %v1902_v34  ;;  %v1951_v9 = vld [vmem:[#allocation5 + $0xd4] ss:$8 sps:$4 sm:$0xff]   ;;  %v1889_v11 = vld [vmem:[#allocation5 + $0x244] ss:$8 sps:$4 sm:$0xff]   ;;  %v1887_v12 = vld [vmem:[#allocation5 + $0x240] ss:$8 sps:$4 sm:$0xff]  }
  0xa5   : > { %968 = vmatprep.subr.bf16.mxu1 %v1903_v35  ;;  %990 = vmatprep.mubr.bf16.mxu1 %v348_v2  ;;  %v1956_v13 = vld [vmem:[#allocation5 + $0xd0] ss:$8 sps:$4 sm:$0xff]   ;;  %v1957_v14 = vld [vmem:[#allocation5 + $0xe4] ss:$8 sps:$4 sm:$0xff]   ;;  %v1963_v17 = vld [vmem:[#allocation5 + $0xf4] ss:$8 sps:$4 sm:$0xff]  }
  0xa6   : > { %1012 = vmatpush1.bf16.msra.mxu0 %v1839_v15  ;;  %v1895_v15 = vld [vmem:[#allocation5 + $0x254] ss:$8 sps:$4 sm:$0xff]   ;;  %v1965_v20 = vld [vmem:[#allocation5 + $0xf0] ss:$8 sps:$4 sm:$0xff]   ;;  %v1899_v23 = vld [vmem:[#allocation5 + $0x260] ss:$8 sps:$4 sm:$0xff]  }
  0xa7   : > { %1013 = vmatprep.subr.bf16.mxu0 %v1840_v16  ;;  %v1962_v16 = vld [vmem:[#allocation5 + $0xe0] ss:$8 sps:$4 sm:$0xff]   ;;  %v1966_v22 = vld [vmem:[#allocation7 + $0x40] sm:$0xff]   ;;  %v1968_v27 = vld [vmem:[#allocation7 + $0x48] sm:$0xff]   ;;  %s1429_s21 = sshll.u32 %s338_s16, 4  ;;  %s1416_s1 = scalar_lea.sflag [#allocation4], %s2419_s13  ;;  %s2460_s21 = int_to_ptr.vmem [resolvable:$true] %s1429_s21 }
  0xa8   : > { %969 = vmatpush1.bf16.msra.mxu1 %v1908_v38  ;;  %v1967_v26 = vld [vmem:[#allocation7] sm:$0xff]   ;;  %v1969_v30 = vld [vmem:[#allocation7 + $0x8] sm:$0xff]   ;;  %v1970_v31 = vld [vmem:[#allocation7 + $0x50] sm:$0xff]   ;;  %s2104_s28 = scalar_lea.vmem %s2460_s21, 128 }
  0xa9   : > { %970 = vmatprep.subr.bf16.mxu1 %v1909_v39  ;;  %v1971_v34 = vld [vmem:[#allocation7 + $0x10] sm:$0xff]   ;;  %v1972_v35 = vld [vmem:[#allocation7 + $0x58] sm:$0xff]   ;;  %v1974_v39 = vld [vmem:[#allocation7 + $0x60] sm:$0xff]   ;;  %p2105_p10 = scmp.ne.s32.totalorder %s2460_s21, %s2104_s28 }
  0xaa   : > { %1014 = vmatpush1.bf16.msra.mxu0 %v1842_v18  ;;  %v1893_v18 = vld [vmem:[#allocation5 + $0x250] ss:$8 sps:$4 sm:$0xff]   ;;  %v1973_v38 = vld [vmem:[#allocation7 + $0x18] sm:$0xff]  }
  0xab   : > { %1015 = vmatprep.subr.bf16.mxu0 %v1843_v19  ;;  %v1901_v19 = vld [vmem:[#allocation5 + $0x264] ss:$8 sps:$4 sm:$0xff]   ;;  %p2106_p3 = pnand %p2105_p10, %p2374_p5 }
  0xac   : > { %971 = vmatpush1.bf16.msra.mxu1 %v1914_v42  ;;  %v1975_v42 = vld [vmem:[#allocation7 + $0x20] sm:$0xff]   ;;  %v1961_v53 = vld [vmem:[#allocation5 + $0x304] ss:$8 sps:$4 sm:$0xff]  }
  0xad   : > { %972 = vmatprep.subr.bf16.mxu1 %v1915_v43  ;;  %v1929_v43 = vld [vmem:[#allocation5 + $0x2b0] ss:$8 sps:$4 sm:$0xff]   ;;  %v1981_v0 = vld [vmem:[#allocation7 + $0x38] sm:$0xff]   ;;  %p2107_p11 = pneg %p2106_p3 }
  0xae   : > { %1016 = vmatpush1.bf16.msra.mxu0 %v1845_v24  ;;  %v1907_v24 = vld [vmem:[#allocation5 + $0x274] ss:$8 sps:$4 sm:$0xff]  }
  0xaf   : > { %1017 = vmatprep.subr.bf16.mxu0 %v1846_v25  ;;  %v347_v25 = vpack.c.bf16 %v340_v21, %v340_v21 }
  0xb0   : > { %973 = vmatpush1.bf16.msra.mxu1 %v1920_v46  ;;  %v1943_v46 = vld [vmem:[#allocation5 + $0x2d4] ss:$8 sps:$4 sm:$0xff]  }
  0xb1   : > { %974 = vmatprep.subr.bf16.mxu1 %v1921_v47  ;;  %v1941_v47 = vld [vmem:[#allocation5 + $0x2d0] ss:$8 sps:$4 sm:$0xff]  }
  0xb2   : > { %1018 = vmatpush1.bf16.msra.mxu0 %v1848_v28  ;;  %v1905_v28 = vld [vmem:[#allocation5 + $0x270] ss:$8 sps:$4 sm:$0xff]  }
  0xb3   : > { %1019 = vmatprep.subr.bf16.mxu0 %v1849_v29  ;;  %v1913_v29 = vld [vmem:[#allocation5 + $0x284] ss:$8 sps:$4 sm:$0xff]  }
  0xb4   : > { %975 = vmatpush1.bf16.msra.mxu1 %v1926_v50  ;;  %v1955_v50 = vld [vmem:[#allocation5 + $0x2f4] ss:$8 sps:$4 sm:$0xff]  }
  0xb5   : > { %976 = vmatprep.subr.bf16.mxu1 %v1927_v52  ;;  %v344_v52 = vld [vmem:[%s2423_s8 + $0x20] sm:$0xff] }
  0xb6   : > { %1020 = vmatpush1.bf16.msra.mxu0 %v1851_v32  ;;  %v1911_v32 = vld [vmem:[#allocation5 + $0x280] ss:$8 sps:$4 sm:$0xff]  }
  0xb7   : > { %1021 = vmatprep.subr.bf16.mxu0 %v1852_v33  ;;  %v1919_v33 = vld [vmem:[#allocation5 + $0x294] ss:$8 sps:$4 sm:$0xff]  }
  0xb8   : > { %977 = vmatpush1.bf16.msra.mxu1 %v1932_v55  ;;  %v1959_v55 = vld [vmem:[#allocation5 + $0x300] ss:$8 sps:$4 sm:$0xff]  }
  0xb9   : > { %978 = vmatprep.subr.bf16.mxu1 %v1933_v56  ;;  %v2188_v56 = vmov 0  }
  0xba   : > { %1022 = vmatpush1.bf16.msra.mxu0 %v1854_v36  ;;  %v1917_v36 = vld [vmem:[#allocation5 + $0x290] ss:$8 sps:$4 sm:$0xff]  }
  0xbb   : > { %1023 = vmatprep.subr.bf16.mxu0 %v1855_v37  ;;  %v1925_v37 = vld [vmem:[#allocation5 + $0x2a4] ss:$8 sps:$4 sm:$0xff]  }
  0xbc   : > { %979 = vmatpush1.bf16.msra.mxu1 %v1938_v62  ;;  %v1979_v62 = vld [vmem:[#allocation7 + $0x30] sm:$0xff]  }
  0xbd   : > { %980 = vmatprep.subr.bf16.mxu1 %v1939_v63  ;;  %v1980_v63 = vld [vmem:[#allocation7 + $0x78] sm:$0xff]  }
  0xbe   : > { %1024 = vmatpush1.bf16.msra.mxu0 %v1857_v40  ;;  %v1923_v40 = vld [vmem:[#allocation5 + $0x2a0] ss:$8 sps:$4 sm:$0xff]  }
  0xbf   : > { %1025 = vmatprep.subr.bf16.mxu0 %v1858_v41  ;;  %v1931_v41 = vld [vmem:[#allocation5 + $0x2b4] ss:$8 sps:$4 sm:$0xff]  }
  0xc0   : > { %981 = vmatpush1.bf16.msra.mxu1 %v1944_v4 }
  0xc1   : > { %982 = vmatprep.subr.bf16.mxu1 %v1945_v5 }
  0xc2   : > { %1026 = vmatpush1.bf16.msra.mxu0 %v1860_v44  ;;  %v1937_v44 = vld [vmem:[#allocation5 + $0x2c4] ss:$8 sps:$4 sm:$0xff]  }
  0xc3   : > { %1027 = vmatprep.subr.bf16.mxu0 %v1861_v45  ;;  %v1935_v45 = vld [vmem:[#allocation5 + $0x2c0] ss:$8 sps:$4 sm:$0xff]  }
  0xc4   : > { %983 = vmatpush1.bf16.msra.mxu1 %v1950_v8 }
  0xc5   : > { %984 = vmatprep.subr.bf16.mxu1 %v1951_v9  ;;  %v452_v9 = vld [vmem:[%s2504_s2] sm:$0x3] }
  0xc6   : > { %1028 = vmatpush1.bf16.msra.mxu0 %v1863_v48  ;;  %v1949_v48 = vld [vmem:[#allocation5 + $0x2e4] ss:$8 sps:$4 sm:$0xff]  }
  0xc7   : > { %1029 = vmatprep.subr.bf16.mxu0 %v1864_v49  ;;  %v1947_v49 = vld [vmem:[#allocation5 + $0x2e0] ss:$8 sps:$4 sm:$0xff]  }
  0xc8   : > { %985 = vmatpush1.bf16.msra.mxu1 %v1956_v13 }
  0xc9   : > { %986 = vmatprep.subr.bf16.mxu1 %v1957_v14 }
  0xca   : > { %1030 = vmatpush1.bf16.msra.mxu0 %v1866_v51  ;;  %v1953_v51 = vld [vmem:[#allocation5 + $0x2f0] ss:$8 sps:$4 sm:$0xff]  }
  0xcb   : > { %1040 = vmatprep.subr.bf16.mxu0 %v1869_v54  ;;  %v351_v54 = vpack.c.bf16 %v344_v52, %v344_v52 }
  0xcc   : > { %987 = vmatpush1.bf16.msra.mxu1 %v1962_v16 }
  0xcd   : > { %1032 = vmatmul.mubr.bf16.vlgmr.msra.gmra.mrb[0].mxu0 %v349_v57  ;;  %988 = vmatprep.subr.bf16.mxu1 %v1963_v17  ;;  %v346_v57 = vld [vmem:[%s2423_s8 + $0x30] sm:$0xff]  ;;  %s2191_s8 = smov [#allocation10]  }
  0xce   : > { %1041 = vmatpush1.bf16.msra.mxu0 %v1867_v59  ;;  %1072 = vmatprep.mubr.bf16.mxu0 %v352_v60  ;;  %v353_v58 = vpack.c.bf16 %v346_v57, %v346_v57  ;;  %v1976_v59 = vld [vmem:[#allocation7 + $0x68] sm:$0xff]   ;;  %s2108_s30 = sshll.u32 %s2191_s8, 4  ;;  %s2109_s30 = int_to_ptr.vmem [resolvable:$false] %s2108_s30 }
  0xcf   : > { %1042 = vmatprep.subr.bf16.mxu0 %v1872_v61  ;;  %v1977_v60 = vld [vmem:[#allocation7 + $0x28] sm:$0xff]   ;;  %v1978_v61 = vld [vmem:[#allocation7 + $0x70] sm:$0xff]   ;;  %s2110_s9 = scalar_lea.vmem %s2109_s30, 256  ;;  %p2111_p12 = scmp.lt.s32.totalorder %s2460_s21, %s2109_s30 }
  0xd0   : > { %989 = vmatpush1.bf16.msra.mxu1 %v1965_v20  ;;  %p2112_p2 = scmp.lt.s32.totalorder %s2110_s9, %s2104_s28 }
  0xd1   : > { %1669 = vmatprep.subr.bf16.mxu1 %v1966_v22 }
  0xd2   : > { %1043 = vmatpush1.bf16.msra.mxu0 %v1870_v1  ;;  %v2189_v1 = vmov 0.0   ;;  %p2113_p1 = por %p2112_p2, %p2111_p12 }
  0xd3   : > { %1044 = vmatprep.subr.bf16.mxu0 %v1877_v3  ;;  %991 = vmatmul.mubr.bf16.vlgmr.msra.gmra.mrb[0].mxu1 %v347_v25 }
  0xd4   : > { %1670 = vmatpush3.bf16.msra.mxu1 %v1967_v26  ;;  %v1983_v26 = vld [vmem:[#allocation8 + $0x8] sm:$0xff]   ;;  %p2114_p4 = pnand %p2113_p1, %p2107_p11 }
  0xd5   : > { %1671 = vmatprep.subr.bf16.mxu1 %v1968_v27  ;;  %v1984_v27 = vld [vmem:[#allocation8 + $0x10] sm:$0xff]  }
  0xd6   : > { %1045 = vmatpush1.bf16.msra.mxu0 %v1875_v6  ;;  %v454_v6 = vlaneseq }
  0xd7   : > { %1046 = vmatprep.subr.bf16.mxu0 %v1883_v7 }
  0xd8   : > { %1672 = vmatpush3.bf16.msra.mxu1 %v1969_v30  ;;  %v455_v7 = vshrl.u32 %v454_v6, 7  ;;  %v1987_v30 = vld [vmem:[#allocation8 + $0x28] sm:$0xff]  }
  0xd9   : > { %1673 = vmatprep.subr.bf16.mxu1 %v1970_v31  ;;  %v1988_v31 = vld [vmem:[#allocation8 + $0x30] sm:$0xff]  }
  0xda   : > { %1047 = vmatpush1.bf16.msra.mxu0 %v1881_v10  ;;  %v456_v8 = vsub.s32 0, %v455_v7  ;;  %v460_v10 = vsub.s32 1, %v455_v7 }
  0xdb   : > { %1048 = vmatprep.subr.bf16.mxu0 %v1889_v11 }
  0xdc   : > { %1674 = vmatpush3.bf16.msra.mxu1 %v1971_v34  ;;  %v457_v11 = vrot.slane %v452_v9, %v456_v8  ;;  %v1639_v34 = vld [vmem:[%s2506_s4] ss:$0 sm:$0xff] }
  0xdd   : > { %1675 = vmatprep.subr.bf16.mxu1 %v1972_v35 }
  0xde   : > { %1049 = vmatpush1.bf16.msra.mxu0 %v1887_v12  ;;  %v461_v12 = vrot.slane %v452_v9, %v460_v10 }
  0xdf   : > { %1050 = vmatprep.subr.bf16.mxu0 %v1895_v15 }
  0xe0   : > { %1676 = vmatpush3.bf16.msra.mxu1 %v1973_v38 }
  0xe1   : > { %1677 = vmatprep.subr.bf16.mxu1 %v1974_v39 }
  0xe2   : > { %1051 = vmatpush1.bf16.msra.mxu0 %v1893_v18 }
  0xe3   : > { %1052 = vmatprep.subr.bf16.mxu0 %v1901_v19 }
  0xe4   : > { %1678 = vmatpush3.bf16.msra.mxu1 %v1975_v42  ;;  %v1656_v42 = vld [vmem:[%s2508_s6] ss:$0 sm:$0xff] }
  0xe5   : > { %1679 = vmatprep.subr.bf16.mxu1 %v1976_v59 }
  0xe6   : > { %1053 = vmatpush1.bf16.msra.mxu0 %v1899_v23 }
  0xe7   : > { %1054 = vmatprep.subr.bf16.mxu0 %v1907_v24  ;;  %v1982_v24 = vld [vmem:[#allocation8] sm:$0xff]  }
  0xe8   : > { %1680 = vmatpush3.bf16.msra.mxu1 %v1977_v60 }
  0xe9   : > { %1681 = vmatprep.subr.bf16.mxu1 %v1978_v61 }
  0xea   : > { %1055 = vmatpush1.bf16.msra.mxu0 %v1905_v28  ;;  %v1985_v28 = vld [vmem:[#allocation8 + $0x18] sm:$0xff]  }
  0xeb   : > { %1056 = vmatprep.subr.bf16.mxu0 %v1913_v29  ;;  %v1986_v29 = vld [vmem:[#allocation8 + $0x20] sm:$0xff]  }
  0xec   : > { %1682 = vmatpush3.bf16.msra.mxu1 %v1979_v62 }
  0xed   : > { %1683 = vmatprep.subr.bf16.mxu1 %v1980_v63 }
  0xee   : > { %1057 = vmatpush1.bf16.msra.mxu0 %v1911_v32  ;;  %v1989_v32 = vld [vmem:[#allocation8 + $0x38] sm:$0xff]  }
  0xef   : > { %1058 = vmatprep.subr.bf16.mxu0 %v1919_v33 }
  0xf0   : > { %1684 = vmatpush3.bf16.msra.mxu1 %v1981_v0 }
  0xf1   : > { %1700 = vmatprep.subr.bf16.mxu1 %v2189_v1 }
  0xf2   : > { %1059 = vmatpush1.bf16.msra.mxu0 %v1917_v36 }
  0xf3   : > { %1060 = vmatprep.subr.bf16.mxu0 %v1925_v37 }
  0xf6   : > { %1061 = vmatpush1.bf16.msra.mxu0 %v1923_v40 }
  0xf7   : > { %1062 = vmatprep.subr.bf16.mxu0 %v1931_v41 }
  0xfa   : > { %1063 = vmatpush1.bf16.msra.mxu0 %v1929_v43 }
  0xfb   : > { %1064 = vmatprep.subr.bf16.mxu0 %v1937_v44 }
  0xfe   : > { %1065 = vmatpush1.bf16.msra.mxu0 %v1935_v45 }
  0xff   : > { %1066 = vmatprep.subr.bf16.mxu0 %v1943_v46 }
 0x102   : > { %1067 = vmatpush1.bf16.msra.mxu0 %v1941_v47 }
 0x103   : > { %1068 = vmatprep.subr.bf16.mxu0 %v1949_v48 }
 0x106   : > { %1069 = vmatpush1.bf16.msra.mxu0 %v1947_v49 }
 0x107   : > { %1070 = vmatprep.subr.bf16.mxu0 %v1955_v50 }
 0x10a   : > { %1071 = vmatpush1.bf16.msra.mxu0 %v1953_v51 }
 0x10b   : > { %1081 = vmatprep.subr.bf16.mxu0 %v1961_v53 }
 0x10d   : > { %1073 = vmatmul.mubr.bf16.vlgmr.msra.gmra.mrb[0].mxu0 %v351_v54 }
 0x10e   : > { %1082 = vmatpush1.bf16.msra.mxu0 %v1959_v55  ;;  %1113 = vmatprep.mubr.bf16.mxu0 %v2188_v56 }
 0x119   : > { %1638 = vmatmul.mubr.msk.bf16.vlgmr.msra.gmra.mrb[0].mxu0 %vm954_vm0, %v353_v58 }
 0x1a6   : > { %v992_v2 = vpop.f32.mrb[0].mxu1 }
 0x1a7   : > { %v994_v3 = vpop.f32.mrb[1].mxu1  ;;  %v993_v13 = vadd.f32 %v992_v2, %v457_v11 }
 0x1a8   : > { %v996_v4 = vpop.f32.mrb[2].mxu1  ;;  %v995_v14 = vadd.f32 %v994_v3, %v461_v12 }
 0x1a9   : > { %v997_v5 = vpop.f32.mrb[3].mxu1 }
 0x1ec   : > { %v1115_v15 = vpop.f32.mrb[0].mxu0 }
 0x1ed   : > { %v1721_v16 = vadd.f32 %v1115_v15, %v993_v13  ;;  %v1117_v17 = vpop.f32.mrb[1].mxu0 }
 0x1ee   : > { %v1723_v18 = vadd.f32 %v1117_v17, %v995_v14  ;;  %v1119_v19 = vpop.f32.mrb[2].mxu0 }
 0x1ef   : > { %v1122_v20 = vmax.f32 %v1721_v16, 0.0  ;;  %v1120_v21 = vpop.f32.mrb[3].mxu0 }
 0x1f0   : > { %v1123_v22 = vmax.f32 %v1723_v18, 0.0 }
 0x1f1   : > { %v1124_v25 = vpack.c.bf16 %v1122_v20, %v1122_v20 }
 0x1f2   : > { %v1125_v23 = vpack.c.bf16 %v1123_v22, %v1123_v22 }
 0x1f4   : > { %1293 = vmatprep.mubr.bf16.mxu1 %v1125_v23 }
 0x1f5   : > { %1294 = vmatmul.mubr.bf16.vlgmr.msra.gmra.mrb[4].mxu1 %v1124_v25 }
 0x1f6   : > { %1701 = vmatpush3.bf16.msra.mxu1 %v1982_v24  ;;  %1716 = vmatprep.mubr.msk.bf16.mxu1 %vm2190_vm1, %v2189_v1 }
 0x1f7   : > { %1702 = vmatprep.subr.bf16.mxu1 %v2189_v1 }
 0x1fa   : > { %1703 = vmatpush3.bf16.msra.mxu1 %v1983_v26 }
 0x1fb   : > { %1704 = vmatprep.subr.bf16.mxu1 %v2189_v1 }
 0x1fe   : > { %1705 = vmatpush3.bf16.msra.mxu1 %v1984_v27 }
 0x1ff   : > { %1706 = vmatprep.subr.bf16.mxu1 %v2189_v1 }
 0x202   : > { %1707 = vmatpush3.bf16.msra.mxu1 %v1985_v28 }
 0x203   : > { %1708 = vmatprep.subr.bf16.mxu1 %v2189_v1 }
 0x206   : > { %1709 = vmatpush3.bf16.msra.mxu1 %v1986_v29 }
 0x207   : > { %1710 = vmatprep.subr.bf16.mxu1 %v2189_v1 }
 0x20a   : > { %1711 = vmatpush3.bf16.msra.mxu1 %v1987_v30 }
 0x20b   : > { %1712 = vmatprep.subr.bf16.mxu1 %v2189_v1 }
 0x20e   : > { %1713 = vmatpush3.bf16.msra.mxu1 %v1988_v31 }
 0x20f   : > { %1714 = vmatprep.subr.bf16.mxu1 %v2189_v1 }
 0x212   : > { %1715 = vmatpush3.bf16.msra.mxu1 %v1989_v32 }
 0x2c8   : > { %v1685_v33 = vpop.f32.mrb[4].mxu1 }
 0x2c9   : > { %v1686_v35 = vpop.f32.mrb[5].mxu1 }
 0x2ca   : > { %v1687_v36 = vadd.f32 %v1686_v35, %v1685_v33  ;;  %v1688_v37 = vpop.f32.mrb[6].mxu1 }
 0x2cb   : > { %v1689_v38 = vpop.f32.mrb[7].mxu1 }
 0x2cc   : > { %v1296_v39 = vadd.f32 %v1687_v36, %v1639_v34 }
 0x2ce   : > { %v1301_v40 = vmax.f32 %v1296_v39, 0.0 }
 0x2d0   : > { %v1302_v41 = vpack.c.bf16 %v1301_v40, %v1301_v40 }
 0x2d2   : > { %1717 = vmatmul.mubr.bf16.vlgmr.msra.gmra.mrb[8].mxu1 %v1302_v41 }
 0x3a5   : > { %v1408_v43 = vpop.f32.mrb[8].mxu1 }
 0x3a6   : > { %v1409_v44 = vadd.f32 %v1656_v42, %v1408_v43  ;;  %v1718_v45 = vpop.f32.mrb[9].mxu1 }
 0x3a7   : > { %v1411_v46 = vpop.f32.mrb[10].mxu1 }
 0x3a8   : > { %1414 = vst [vmem:[%s338_s16] sm:$0xff] %v1409_v44  ;;  %v1719_v47 = vpop.f32.mrb[11].mxu1 }
 0x3a9   : > { %2117 = shalt.err (!%p2114_p4)
}
 0x3aa   : > { %s2118_s13 = scalar_lea.hbm %s2458_s15, 128  ;;  %s2122_s11 = scalar_lea.hbm %s2509_s7, 256 }
 0x3ab   : > { %p2119_p0 = scmp.ne.s32.totalorder %s2458_s15, %s2118_s13  ;;  %p2123_p8 = scmp.lt.u32.totalorder %s2458_s15, %s2509_s7 }
 0x3ac   : > { %p2124_p13 = scmp.lt.u32.totalorder %s2122_s11, %s2118_s13  ;;  %p2126_p10 = scmp.lt.u32.totalorder %s2118_s13, %s2458_s15 }
 0x3ad   : > { %p2120_p9 = pnand %p2119_p0, %p2374_p5 }
 0x3ae   : > { %p2125_p6 = por %p2124_p13, %p2123_p8 }
 0x3af   : > { %p2121_p7 = pneg %p2120_p9 }
 0x3b0   : > { %p2127_p3 = por %p2126_p10, %p2125_p6 }
 0x3b2   : > { %p2128_p11 = pnand %p2127_p3, %p2121_p7 }
 0x3b4   : > { %2131 = shalt.err (!%p2128_p11)
}
 0x3b5   : > { %1749 = dma.vmem_to_hbm [thread:$0]  (%p2374_p5), %s2460_s21, 128, %s2458_s15, %s1416_s1  }
 0x3b6 PF: > { %s2531_s29 = sld [smem:[#allocation15_spill]]  ;;  %s1441_s16 = sand.u32 1, %s2166_s24  }
 0x3b7   : > { %p2533_p2 = scmp.ge.s32.totalorder %s2178_s27, 2  ;;  %s1442_s10 = scalar_lea.sflag [#allocation4], %s1441_s16 }
 0x3bc   : > { %p2532_p12 = scmp.ne.s32.totalorder %s2531_s29, 0 }
 0x3be   : > { %p1766_p1 = pnand %p2533_p2, %p2532_p12 }
 0x3c0   : > { %2161 = dma.done.wait (!%p1766_p1), %s1442_s10, 128  }
 0x3c1   : > { %2163 = vsyncadd (!%p1766_p1), %s1442_s10, 4294967168  ;;  %p22_p4 = scmp.ge.s32.totalorder %s2342_s18, 4   ;;  %s2534_s24 = smov %s2170_s25 }
 0x3c2   : > { %s2535_s25 = smov %s2174_s26  ;;  %s2536_s26 = smov %s2370_s12 }
 0x3c3   : > { %s2537_s27 = smov %s2342_s18  ;;  %24 = sbr.rel (!%p22_p4) target bundleno = 9 (0x9), region = 105 }
 0x3ca   :  { %1447 = vsyncpa [#allocation3], 1 }
 0x3cb   :  { %1449 = vsyncpa [#allocation3 + $0x1], 1 }
 0x3cc   :  { %1450 = vsyncpa [#allocation6], 1 }
 0x3cd   :  { %1451 = vsyncpa [#allocation9], 1 }
 0x3ce   :  { %1452 = vsyncpa [#allocation4], 1 }
 0x3cf   :  { %1454 = vsyncpa [#allocation4 + $0x1], 1 }

</bundles_post_ra>
